<compile_context>
chip_gen: v7x
topology: tpu7x:2x2x1
jax: 0.10.0
libtpu: 0.0.40
codegen_flags: <defaults>
</compile_context>

<pallas_src>
import functools

import jax
import jax.numpy as jnp
from jax.experimental import pallas as pl
from jax.experimental.pallas import tpu as pltpu

LANE = 128
SUBLANE_BF16 = 16  # native sublane tile for bf16-packed rows


def _round_up(x, m):
    return ((x + m - 1) // m) * m


def _mlp_kernel(*refs, num_hidden):
    """refs = (x_ref, w0, b0, w1, b1, ..., wL, bL, out_ref, h_scratch).

    Hidden layers (first `num_hidden` (w, b) pairs) use ReLU; the last Linear has no
    activation. Matmuls run on the MXU with bf16 inputs and f32 accumulation; bias-add
    and ReLU stay in f32 on the VPU. Dropout is identity (eval mode). The inter-layer
    activation is staged through a bf16 VMEM scratch to bound vreg pressure.
    """
    x_ref = refs[0]
    h_scratch = refs[-1]
    out_ref = refs[-2]
    param_refs = refs[1:-2]
    n_layers = len(param_refs) // 2

    h = x_ref[...]  # bf16 batch tile, fed straight to layer 0 (no staging copy)

    for li in range(n_layers):
        w_ref = param_refs[2 * li]
        b_ref = param_refs[2 * li + 1]
        n = w_ref.shape[1]  # static, multiple of 128

        acc = jnp.dot(h, w_ref[...], preferred_element_type=jnp.float32)  # MXU, f32 acc
        acc = acc + b_ref[...]                                            # f32 bias-add
        if li < num_hidden:
            acc = jnp.maximum(acc, 0.0)                                   # ReLU (f32)
            # Dropout (p=0.5) in eval mode == identity.
        if li < n_layers - 1:
            h_scratch[:, :n] = acc.astype(jnp.bfloat16)  # single bf16 store per layer
            h = h_scratch[:, :n]                         # bf16 reload for next matmul
        else:
            out_ref[...] = acc.astype(out_ref.dtype)     # lane-dense store (n % 128 == 0)


def mlp_forward(x, params, *, batch_tile=256):
    """x: [B, input_size] f32; params: list of (W [in,out], b [1,out] or [out]) per Linear."""
    B, in_dim = x.shape
    num_hidden = len(params) - 1
    out_dim = params[-1][0].shape[1]
    out_dtype = x.dtype

    # ---- pad feature dims to multiples of 128 (lane-dense) ----
    in_pad = _round_up(in_dim, LANE)
    widths = [w.shape[1] for w, _ in params]
    widths_pad = [_round_up(wd, LANE) for wd in widths]
    out_pad = widths_pad[-1]

    # ---- batch tiling: TB multiple of 16 (bf16 rows); >=2 programs when B is large ----
    if B <= SUBLANE_BF16:
        TB = SUBLANE_BF16
    else:
        TB = min(batch_tile, _round_up(-(-B // 2), SUBLANE_BF16))
    B_pad = _round_up(B, TB)
    grid = (B_pad // TB,)

    # ---- pad + cast inputs (x -> bf16, weights -> bf16, biases stay f32) ----
    x_p = (jnp.zeros((B_pad, in_pad), jnp.bfloat16)
           .at[:B, :in_dim].set(x.astype(jnp.bfloat16)))

    padded_params = []
    prev_dim, prev_pad = in_dim, in_pad
    for (w, b), wd, wd_pad in zip(params, widths, widths_pad):
        w_p = (jnp.zeros((prev_pad, wd_pad), jnp.bfloat16)
               .at[:prev_dim, :wd].set(w.astype(jnp.bfloat16)))
        b_p = (jnp.zeros((1, wd_pad), jnp.float32)
               .at[:, :wd].set(b.reshape(1, -1).astype(jnp.float32)))
        padded_params.append((w_p, b_p))
        prev_dim, prev_pad = wd, wd_pad

    flat_inputs = [x_p]
    for w_p, b_p in padded_params:
        flat_inputs += [w_p, b_p]

    # ---- BlockSpecs: x/out tiled over batch; params resident & single-buffered ----
    in_specs = [pl.BlockSpec((TB, in_pad), lambda i: (i, 0))]
    for w_p, b_p in padded_params:
        in_specs.append(pl.BlockSpec(w_p.shape, lambda i: (0, 0),
                                     pipeline_mode=pl.Buffered(1)))
        in_specs.append(pl.BlockSpec(b_p.shape, lambda i: (0, 0),
                                     pipeline_mode=pl.Buffered(1)))
    out_specs = pl.BlockSpec((TB, out_pad), lambda i: (i, 0))

    # Scratch holds only inter-layer (hidden) activations; last layer writes out_ref.
    scratch_width = max(widths_pad[:-1]) if len(params) > 1 else LANE
    scratch_shapes = [pltpu.VMEM((TB, scratch_width), jnp.bfloat16)]

    # ---- VMEM budget: double-buffered x/out tiles + single-copy params + bf16 scratch ----
    def nbytes(a):
        return a.size * a.dtype.itemsize
    tile_bytes = TB * in_pad * 2 + TB * out_pad * jnp.dtype(out_dtype).itemsize
    param_bytes = sum(nbytes(a) for w_p, b_p in padded_params for a in (w_p, b_p))
    scratch_bytes = TB * scratch_width * 2
    margin = 4 << 20
    vmem_needed = 2 * tile_bytes + param_bytes + scratch_bytes + margin
    vmem_limit = int(min(max(vmem_needed, 16 << 20), 48 << 20))  # never claim full v7x VMEM
    if vmem_needed > (48 << 20):
        # TODO(synk): switch to the K/N-tiled streamed-weights path here instead of failing.
        raise NotImplementedError(
            "Padded bf16 params + tiles exceed the resident-VMEM budget; "
            "streamed-weights (K/N-tiled) path not implemented yet.")

    # ---- cost estimate for XLA scheduling around the fused call ----
    flops = 2 * B_pad * sum(w_p.shape[0] * w_p.shape[1] for w_p, _ in padded_params)
    bytes_accessed = (nbytes(x_p) + param_bytes
                      + B_pad * out_pad * jnp.dtype(out_dtype).itemsize)
    cost = pl.CostEstimate(flops=flops, transcendentals=0, bytes_accessed=bytes_accessed)

    kernel = functools.partial(_mlp_kernel, num_hidden=num_hidden)

    out_padded = pl.pallas_call(
        kernel,
        out_shape=jax.ShapeDtypeStruct((B_pad, out_pad), out_dtype),
        grid_spec=pltpu.PrefetchScalarGridSpec(
            num_scalar_prefetch=0,
            grid=grid,
            in_specs=in_specs,
            out_specs=out_specs,
            scratch_shapes=scratch_shapes,
        ),
        compiler_params=pltpu.CompilerParams(
            dimension_semantics=("parallel",),
            vmem_limit_bytes=vmem_limit,
        ),
        cost_estimate=cost,
    )(*flat_inputs)

    return out_padded[:B, :out_dim]


def init_params(key, input_size, hidden_sizes, output_size, dtype=jnp.float32):
    """Deterministic init mimicking nn.Linear's U(-1/sqrt(fan_in), 1/sqrt(fan_in))."""
    params = []
    prev = input_size
    sizes = list(hidden_sizes) + [output_size]
    for size in sizes:
        key, kw, kb = jax.random.split(key, 3)
        bound = 1.0 / jnp.sqrt(prev)
        w = jax.random.uniform(kw, (prev, size), dtype, -bound, bound)
        b = jax.random.uniform(kb, (1, size), dtype, -bound, bound)
        params.append((w, b))
        prev = size
    return params


def mlp_reference(x, params):
    """Plain-JAX f32 reference for correctness checking."""
    h = x
    for i, (w, b) in enumerate(params):
        h = h @ w + b.reshape(1, -1)
        if i < len(params) - 1:
            h = jnp.maximum(h, 0.0)
    return h


if __name__ == "__main__":
    key = jax.random.PRNGKey(0)

    batch = 8
    input_size = 32
    hidden_sizes = [64, 32]
    output_size = 4

    key, kx = jax.random.split(key)
    x = jax.random.normal(kx, (batch, input_size), jnp.float32)
    params = init_params(key, input_size, hidden_sizes, output_size)

    out = mlp_forward(x, params)
    out = jax.block_until_ready(out)

    ref = mlp_reference(x, params)
    assert out.shape == (batch, output_size)
    # bf16 MXU inputs / bf16 inter-layer activations (f32 accumulation) -> loosened
    # tolerance vs the f32 reference.
    assert jnp.allclose(out, ref, atol=5e-2, rtol=5e-2), (out, ref)

    print("KERNEL_OK")
</pallas_src>

<mosaic_0001>
module attributes {stable_mosaic.version = 11 : i64} {
  func.func @_mlp_kernel(%arg0: i32, %arg1: memref<16x128xbf16, #tpu.memory_space<vmem>>, %arg2: memref<128x128xbf16, #tpu.memory_space<vmem>>, %arg3: memref<1x128xf32, #tpu.memory_space<vmem>>, %arg4: memref<128x128xbf16, #tpu.memory_space<vmem>>, %arg5: memref<1x128xf32, #tpu.memory_space<vmem>>, %arg6: memref<128x128xbf16, #tpu.memory_space<vmem>>, %arg7: memref<1x128xf32, #tpu.memory_space<vmem>>, %arg8: memref<16x128xf32, #tpu.memory_space<vmem>>, %arg9: memref<16x128xbf16, #tpu.memory_space<vmem>>) attributes {dimension_semantics = [#tpu.dimension_semantics<parallel>], iteration_bounds = array<i64: 1>, scalar_prefetch = 0 : i64, scratch_operands = 1 : i64, tpu.core_type = #tpu.core_type<tc>, window_params = [{transform_indices = @transform_0, window_bounds = array<i64: 16, 128>}, {pipeline_mode = #tpu.pipeline_mode<synchronous>, transform_indices = @transform_1, window_bounds = array<i64: 128, 128>}, {pipeline_mode = #tpu.pipeline_mode<synchronous>, transform_indices = @transform_2, window_bounds = array<i64: 1, 128>}, {pipeline_mode = #tpu.pipeline_mode<synchronous>, transform_indices = @transform_3, window_bounds = array<i64: 128, 128>}, {pipeline_mode = #tpu.pipeline_mode<synchronous>, transform_indices = @transform_4, window_bounds = array<i64: 1, 128>}, {pipeline_mode = #tpu.pipeline_mode<synchronous>, transform_indices = @transform_5, window_bounds = array<i64: 128, 128>}, {pipeline_mode = #tpu.pipeline_mode<synchronous>, transform_indices = @transform_6, window_bounds = array<i64: 1, 128>}, {transform_indices = @transform_7, window_bounds = array<i64: 16, 128>}]} {
    %c0 = arith.constant 0 : index
    %c0_0 = arith.constant 0 : index
    %0 = vector.load %arg1[%c0, %c0_0] : memref<16x128xbf16, #tpu.memory_space<vmem>>, vector<16x128xbf16>
    %c0_1 = arith.constant 0 : index
    %c0_2 = arith.constant 0 : index
    %1 = vector.load %arg2[%c0_1, %c0_2] : memref<128x128xbf16, #tpu.memory_space<vmem>>, vector<128x128xbf16>
    %cst = arith.constant dense<0.000000e+00> : vector<16x128xf32>
    %2 = tpu.matmul %0, %1, %cst {dimension_numbers = #tpu.dot_dimension_numbers<[1], [0], [0], [1], [0, 0, 1, 1], [], []>} : vector<16x128xbf16>, vector<128x128xbf16>, vector<16x128xf32> -> vector<16x128xf32>
    %c0_3 = arith.constant 0 : index
    %c0_4 = arith.constant 0 : index
    %3 = vector.load %arg3[%c0_3, %c0_4] : memref<1x128xf32, #tpu.memory_space<vmem>>, vector<1x128xf32>
    %4 = vector.broadcast %3 : vector<1x128xf32> to vector<16x128xf32>
    %5 = arith.addf %2, %4 : vector<16x128xf32>
    %cst_5 = arith.constant 0.000000e+00 : f32
    %6 = vector.broadcast %cst_5 : f32 to vector<16x128xf32>
    %7 = arith.maximumf %5, %6 : vector<16x128xf32>
    %8 = arith.truncf %7 : vector<16x128xf32> to vector<16x128xbf16>
    %c0_6 = arith.constant 0 : index
    %c0_7 = arith.constant 0 : index
    %9 = vector.load %arg9[%c0_6, %c0_7] : memref<16x128xbf16, #tpu.memory_space<vmem>>, vector<16x128xbf16>
    tpu.vector_store %arg9[%c0_6, %c0_7], %8 {strides = array<i32>} : memref<16x128xbf16, #tpu.memory_space<vmem>>, vector<16x128xbf16>,
    %c0_8 = arith.constant 0 : index
    %c0_9 = arith.constant 0 : index
    %10 = vector.load %arg9[%c0_8, %c0_9] : memref<16x128xbf16, #tpu.memory_space<vmem>>, vector<16x128xbf16>
    %c0_10 = arith.constant 0 : index
    %c0_11 = arith.constant 0 : index
    %11 = vector.load %arg4[%c0_10, %c0_11] : memref<128x128xbf16, #tpu.memory_space<vmem>>, vector<128x128xbf16>
    %cst_12 = arith.constant dense<0.000000e+00> : vector<16x128xf32>
    %12 = tpu.matmul %10, %11, %cst_12 {dimension_numbers = #tpu.dot_dimension_numbers<[1], [0], [0], [1], [0, 0, 1, 1], [], []>} : vector<16x128xbf16>, vector<128x128xbf16>, vector<16x128xf32> -> vector<16x128xf32>
    %c0_13 = arith.constant 0 : index
    %c0_14 = arith.constant 0 : index
    %13 = vector.load %arg5[%c0_13, %c0_14] : memref<1x128xf32, #tpu.memory_space<vmem>>, vector<1x128xf32>
    %14 = vector.broadcast %13 : vector<1x128xf32> to vector<16x128xf32>
    %15 = arith.addf %12, %14 : vector<16x128xf32>
    %cst_15 = arith.constant 0.000000e+00 : f32
    %16 = vector.broadcast %cst_15 : f32 to vector<16x128xf32>
    %17 = arith.maximumf %15, %16 : vector<16x128xf32>
    %18 = arith.truncf %17 : vector<16x128xf32> to vector<16x128xbf16>
    %c0_16 = arith.constant 0 : index
    %c0_17 = arith.constant 0 : index
    %19 = vector.load %arg9[%c0_16, %c0_17] : memref<16x128xbf16, #tpu.memory_space<vmem>>, vector<16x128xbf16>
    tpu.vector_store %arg9[%c0_16, %c0_17], %18 {strides = array<i32>} : memref<16x128xbf16, #tpu.memory_space<vmem>>, vector<16x128xbf16>,
    %c0_18 = arith.constant 0 : index
    %c0_19 = arith.constant 0 : index
    %20 = vector.load %arg9[%c0_18, %c0_19] : memref<16x128xbf16, #tpu.memory_space<vmem>>, vector<16x128xbf16>
    %c0_20 = arith.constant 0 : index
    %c0_21 = arith.constant 0 : index
    %21 = vector.load %arg6[%c0_20, %c0_21] : memref<128x128xbf16, #tpu.memory_space<vmem>>, vector<128x128xbf16>
    %cst_22 = arith.constant dense<0.000000e+00> : vector<16x128xf32>
    %22 = tpu.matmul %20, %21, %cst_22 {dimension_numbers = #tpu.dot_dimension_numbers<[1], [0], [0], [1], [0, 0, 1, 1], [], []>} : vector<16x128xbf16>, vector<128x128xbf16>, vector<16x128xf32> -> vector<16x128xf32>
    %c0_23 = arith.constant 0 : index
    %c0_24 = arith.constant 0 : index
    %23 = vector.load %arg7[%c0_23, %c0_24] : memref<1x128xf32, #tpu.memory_space<vmem>>, vector<1x128xf32>
    %24 = vector.broadcast %23 : vector<1x128xf32> to vector<16x128xf32>
    %25 = arith.addf %22, %24 : vector<16x128xf32>
    %c0_25 = arith.constant 0 : index
    %c0_26 = arith.constant 0 : index
    %26 = vector.load %arg8[%c0_25, %c0_26] : memref<16x128xf32, #tpu.memory_space<vmem>>, vector<16x128xf32>
    tpu.vector_store %arg8[%c0_25, %c0_26], %25 {strides = array<i32>} : memref<16x128xf32, #tpu.memory_space<vmem>>, vector<16x128xf32>,
    return
  }
  func.func @transform_0(%arg0: i32) -> (i32, i32) {
    %c0_i32 = arith.constant 0 : i32
    %c0_i32_0 = arith.constant 0 : i32
    return %arg0, %c0_i32 : i32, i32
  }
  func.func @transform_1(%arg0: i32) -> (i32, i32) {
    %c0_i32 = arith.constant 0 : i32
    %c0_i32_0 = arith.constant 0 : i32
    %c0_i32_1 = arith.constant 0 : i32
    return %c0_i32, %c0_i32_0 : i32, i32
  }
  func.func @transform_2(%arg0: i32) -> (i32, i32) {
    %c0_i32 = arith.constant 0 : i32
    %c0_i32_0 = arith.constant 0 : i32
    %c0_i32_1 = arith.constant 0 : i32
    return %c0_i32, %c0_i32_0 : i32, i32
  }
  func.func @transform_3(%arg0: i32) -> (i32, i32) {
    %c0_i32 = arith.constant 0 : i32
    %c0_i32_0 = arith.constant 0 : i32
    %c0_i32_1 = arith.constant 0 : i32
    return %c0_i32, %c0_i32_0 : i32, i32
  }
  func.func @transform_4(%arg0: i32) -> (i32, i32) {
    %c0_i32 = arith.constant 0 : i32
    %c0_i32_0 = arith.constant 0 : i32
    %c0_i32_1 = arith.constant 0 : i32
    return %c0_i32, %c0_i32_0 : i32, i32
  }
  func.func @transform_5(%arg0: i32) -> (i32, i32) {
    %c0_i32 = arith.constant 0 : i32
    %c0_i32_0 = arith.constant 0 : i32
    %c0_i32_1 = arith.constant 0 : i32
    return %c0_i32, %c0_i32_0 : i32, i32
  }
  func.func @transform_6(%arg0: i32) -> (i32, i32) {
    %c0_i32 = arith.constant 0 : i32
    %c0_i32_0 = arith.constant 0 : i32
    %c0_i32_1 = arith.constant 0 : i32
    return %c0_i32, %c0_i32_0 : i32, i32
  }
  func.func @transform_7(%arg0: i32) -> (i32, i32) {
    %c0_i32 = arith.constant 0 : i32
    %c0_i32_0 = arith.constant 0 : i32
    return %arg0, %c0_i32 : i32, i32
  }
}

</mosaic_0001>

<bundles_post_ra>
// kernel: tpu_custom_call.1
= control target key start
LH: loop header
LB: loop body
LE: loop exit
PB: predicated region body
PF: predicated region fallthrough
CT: control target
= control target key end

     0   :  { %12 = vsyncpa [#allocation4], 0  ;;  %s903_s0 = inlined_call_operand.hbm [shape: bf16[16,128], index: 0, kind: input, shape index: {}]   ;;  %s904_s1 = inlined_call_operand.hbm [shape: bf16[128,128], index: 1, kind: input, shape index: {}]   ;;  %s905_s2 = inlined_call_operand.vmem [shape: f32[1,128], index: 2, kind: input, shape index: {}]   ;;  %s906_s3 = inlined_call_operand.hbm [shape: bf16[128,128], index: 3, kind: input, shape index: {}]   ;;  %s907_s4 = inlined_call_operand.vmem [shape: f32[1,128], index: 4, kind: input, shape index: {}]   ;;  %s908_s5 = inlined_call_operand.hbm [shape: bf16[128,128], index: 5, kind: input, shape index: {}]   ;;  %s909_s6 = inlined_call_operand.vmem [shape: f32[1,128], index: 6, kind: input, shape index: {}]   ;;  %s910_s7 = inlined_call_operand.hbm [shape: f32[16,128], index: 7, kind: output, shape index: {}]  }
   0x1   :  { %13 = vsyncpa [#allocation7], 0 }
   0x2   :  { %14 = vsyncpa [#allocation10], 0 }
   0x3   :  { %15 = vsyncpa [#allocation5], 0  ;;  %s727_s24 = smov [#allocation6]   ;;  %s728_s26 = smov [#allocation3]  }
   0x4   :  { %s33_s25 = sshll.u32 %s727_s24, 4  ;;  %s21_s27 = sshll.u32 %s728_s26, 4  ;;  %s34_s25 = int_to_ptr.vmem [resolvable:$true] %s33_s25  ;;  %s778_s27 = int_to_ptr.vmem [resolvable:$true] %s21_s27 }
   0x5   :  { %s609_s30 = scalar_lea.hbm %s904_s1, 1024 }
   0x6   :  { %p610_p0 = scmp.ne.s32.totalorder %s904_s1, %s609_s30  ;;  %p613_p1 = scmp.lt.u32.totalorder %s609_s30, %s904_s1 }
   0x8   :  { %p615_p2 = pnand %p613_p1, %p610_p0 }
   0xa   :  { %618 = shalt.err (!%p615_p2)
}
   0xb   :  { %s619_s12 = scalar_lea.vmem %s34_s25, 1024  ;;  %p624_p4 = scmp.lt.s32.totalorder %s34_s25, %s34_s25 }
   0xc   :  { %p620_p3 = scmp.ne.s32.totalorder %s34_s25, %s619_s12  ;;  %p625_p5 = scmp.lt.s32.totalorder %s619_s12, %s619_s12 }
   0xe   :  { %p626_p6 = por %p625_p5, %p624_p4 }
  0x10   :  { %p627_p7 = pnand %p626_p6, %p620_p3 }
  0x12   :  { %630 = shalt.err (!%p627_p7)
}
  0x13   :  { %s729_s13 = smov 64   ;;  %s730_s14 = smov 4  }
  0x14   :  { %39 = dma.hbm_to_vmem [thread:$0]  %s904_s1, 1024, %s34_s25, [#allocation7], %s729_s13, %s729_s13, %s730_s14  }
  0x15   :  { %s631_s19 = scalar_lea.hbm %s903_s0, 128 }
  0x16   :  { %p632_p8 = scmp.ne.s32.totalorder %s903_s0, %s631_s19  ;;  %p635_p9 = scmp.lt.u32.totalorder %s631_s19, %s903_s0 }
  0x18   :  { %p637_p10 = pnand %p635_p9, %p632_p8 }
  0x1a   :  { %640 = shalt.err (!%p637_p10)
}
  0x1b   :  { %s641_s24 = scalar_lea.vmem %s778_s27, 128  ;;  %p646_p12 = scmp.lt.s32.totalorder %s778_s27, %s778_s27 }
  0x1c   :  { %p642_p11 = scmp.ne.s32.totalorder %s778_s27, %s641_s24  ;;  %p647_p13 = scmp.lt.s32.totalorder %s641_s24, %s641_s24 }
  0x1e   :  { %p648_p0 = por %p647_p13, %p646_p12 }
  0x20   :  { %p649_p1 = pnand %p648_p0, %p642_p11 }
  0x22   :  { %652 = shalt.err (!%p649_p1)
}
  0x23   :  { %27 = dma.hbm_to_vmem [thread:$0]  %s903_s0, 128, %s778_s27, [#allocation4], %s729_s13, %s729_s13, %s730_s14  }
  0x24   :  { %s731_s26 = smov [#allocation8]   ;;  %s732_s29 = smov [#allocation9]  }
  0x25   :  { %s47_s28 = sshll.u32 %s731_s26, 4  ;;  %s61_s30 = sshll.u32 %s732_s29, 4  ;;  %s48_s28 = int_to_ptr.vmem [resolvable:$true] %s47_s28  ;;  %s815_s30 = int_to_ptr.vmem [resolvable:$true] %s61_s30 }
  0x26   :  { %s653_s10 = scalar_lea.hbm %s906_s3, 1024 }
  0x27   :  { %p654_p2 = scmp.ne.s32.totalorder %s906_s3, %s653_s10  ;;  %p657_p3 = scmp.lt.u32.totalorder %s653_s10, %s906_s3 }
  0x29   :  { %p659_p4 = pnand %p657_p3, %p654_p2 }
  0x2b   :  { %662 = shalt.err (!%p659_p4)
}
  0x2c   :  { %s663_s0 = scalar_lea.vmem %s48_s28, 1024  ;;  %p668_p6 = scmp.lt.s32.totalorder %s48_s28, %s48_s28 }
  0x2d   :  { %p664_p5 = scmp.ne.s32.totalorder %s48_s28, %s663_s0  ;;  %p669_p7 = scmp.lt.s32.totalorder %s663_s0, %s663_s0 }
  0x2f   :  { %p670_p8 = por %p669_p7, %p668_p6 }
  0x31   :  { %p671_p9 = pnand %p670_p8, %p664_p5 }
  0x33   :  { %674 = shalt.err (!%p671_p9)
}
  0x34   :  { %53 = dma.hbm_to_vmem [thread:$0]  %s906_s3, 1024, %s48_s28, [#allocation7], %s729_s13, %s729_s13, %s730_s14  }
  0x35   :  { %s675_s20 = scalar_lea.hbm %s908_s5, 1024 }
  0x36   :  { %p676_p10 = scmp.ne.s32.totalorder %s908_s5, %s675_s20  ;;  %p679_p11 = scmp.lt.u32.totalorder %s675_s20, %s908_s5 }
  0x38   :  { %p681_p12 = pnand %p679_p11, %p676_p10 }
  0x3a   :  { %684 = shalt.err (!%p681_p12)
}
  0x3b   :  { %s685_s1 = scalar_lea.vmem %s815_s30, 1024  ;;  %p690_p0 = scmp.lt.s32.totalorder %s815_s30, %s815_s30 }
  0x3c   :  { %p686_p13 = scmp.ne.s32.totalorder %s815_s30, %s685_s1  ;;  %p691_p1 = scmp.lt.s32.totalorder %s685_s1, %s685_s1 }
  0x3e   :  { %p692_p2 = por %p691_p1, %p690_p0 }
  0x40   :  { %p693_p3 = pnand %p692_p2, %p686_p13 }
  0x42   :  { %696 = shalt.err (!%p693_p3)
}
  0x43   :  { %67 = dma.hbm_to_vmem [thread:$0]  %s908_s5, 1024, %s815_s30, [#allocation10], %s729_s13, %s729_s13, %s730_s14  }
  0x44   :  { %719 = dma.done.wait [#allocation4], 128  }
  0x45   :  { %720 = vsyncadd [#allocation4], 4294967168 }
  0x46   :  { %721 = dma.done.wait [#allocation7], 2048  }
  0x47   :  { %722 = vsyncadd [#allocation7], 4294965248 }
  0x48   :  { %723 = dma.done.wait [#allocation10], 1024  }
  0x49   :  { %724 = vsyncadd [#allocation10], 4294966272  ;;  %v733_v0 = vmov 0.0   ;;  %vm734_vm0 = vmmov 0   ;;  %v584_v1 = vld [vmem:[#allocation6] sm:$0xff]   ;;  %v585_v2 = vld [vmem:[#allocation6 + $0x8] sm:$0xff]  }
  0x4a   :  { %513 = vmatprep.subr.bf16.mxu0 %v733_v0  ;;  %529 = vmatprep.mubr.msk.bf16.mxu0 %vm734_vm0, %v733_v0  ;;  %v586_v3 = vld [vmem:[#allocation6 + $0x10] sm:$0xff]   ;;  %v593_v4 = vld [vmem:[#allocation8] sm:$0xff]   ;;  %v587_v5 = vld [vmem:[#allocation6 + $0x18] sm:$0xff]   ;;  %s735_s29 = smov [#allocation11]  }
  0x4b   :  { %533 = vmatprep.subr.bf16.mxu1 %v733_v0  ;;  %549 = vmatprep.mubr.msk.bf16.mxu1 %vm734_vm0, %v733_v0  ;;  %v594_v6 = vld [vmem:[#allocation8 + $0x8] sm:$0xff]   ;;  %v588_v7 = vld [vmem:[#allocation6 + $0x20] sm:$0xff]   ;;  %v595_v8 = vld [vmem:[#allocation8 + $0x10] sm:$0xff]   ;;  %s444_s30 = sshll.u32 %s735_s29, 4  ;;  %s445_s30 = int_to_ptr.vmem [resolvable:$true] %s444_s30 }
  0x4c   :  { %514 = vmatpush3.bf16.msra.mxu0 %v584_v1  ;;  %534 = vmatpush3.bf16.msra.mxu1 %v593_v4  ;;  %v589_v9 = vld [vmem:[#allocation6 + $0x28] sm:$0xff]   ;;  %v596_v10 = vld [vmem:[#allocation8 + $0x18] sm:$0xff]   ;;  %v590_v11 = vld [vmem:[#allocation6 + $0x30] sm:$0xff]   ;;  %p702_p5 = scmp.lt.s32.totalorder %s445_s30, %s445_s30 }
  0x4d   :  { %515 = vmatprep.subr.bf16.mxu0 %v733_v0  ;;  %535 = vmatprep.subr.bf16.mxu1 %v733_v0  ;;  %v597_v12 = vld [vmem:[#allocation8 + $0x20] sm:$0xff]   ;;  %v591_v13 = vld [vmem:[#allocation6 + $0x38] sm:$0xff]   ;;  %v598_v14 = vld [vmem:[#allocation8 + $0x28] sm:$0xff]  }
  0x4e   :  { %v592_v15 = vld [vmem:[#allocation3] sm:$0xff]   ;;  %v599_v16 = vld [vmem:[#allocation8 + $0x30] sm:$0xff]   ;;  %v601_v18 = vld [vmem:[#allocation9] sm:$0xff]  }
  0x4f   :  { %v600_v17 = vld [vmem:[#allocation8 + $0x38] sm:$0xff]   ;;  %v602_v19 = vld [vmem:[#allocation9 + $0x8] sm:$0xff]   ;;  %v603_v20 = vld [vmem:[#allocation9 + $0x10] sm:$0xff]  }
  0x50   :  { %516 = vmatpush3.bf16.msra.mxu0 %v585_v2  ;;  %536 = vmatpush3.bf16.msra.mxu1 %v594_v6  ;;  %v604_v21 = vld [vmem:[#allocation9 + $0x18] sm:$0xff]   ;;  %v605_v22 = vld [vmem:[#allocation9 + $0x20] sm:$0xff]   ;;  %v606_v23 = vld [vmem:[#allocation9 + $0x28] sm:$0xff]  }
  0x51   :  { %517 = vmatprep.subr.bf16.mxu0 %v733_v0  ;;  %537 = vmatprep.subr.bf16.mxu1 %v733_v0  ;;  %v458_v24 = vld [vmem:[%s905_s2] ss:$0 sm:$0xff]  ;;  %v607_v34 = vld [vmem:[#allocation9 + $0x30] sm:$0xff]  }
  0x52   :  { %v608_v35 = vld [vmem:[#allocation9 + $0x38] sm:$0xff]  }
  0x53   :  { %v468_v36 = vld [vmem:[%s907_s4] ss:$0 sm:$0xff]  ;;  %s697_s4 = scalar_lea.vmem %s445_s30, 256 }
  0x54   :  { %518 = vmatpush3.bf16.msra.mxu0 %v586_v3  ;;  %538 = vmatpush3.bf16.msra.mxu1 %v595_v8  ;;  %v477_v46 = vld [vmem:[%s909_s6] ss:$0 sm:$0xff]  ;;  %p698_p4 = scmp.ne.s32.totalorder %s445_s30, %s697_s4  ;;  %p703_p6 = scmp.lt.s32.totalorder %s697_s4, %s697_s4 }
  0x55   :  { %519 = vmatprep.subr.bf16.mxu0 %v733_v0  ;;  %539 = vmatprep.subr.bf16.mxu1 %v733_v0 }
  0x56   :  { %p704_p7 = por %p703_p6, %p702_p5 }
  0x58   :  { %520 = vmatpush3.bf16.msra.mxu0 %v587_v5  ;;  %540 = vmatpush3.bf16.msra.mxu1 %v596_v10  ;;  %p705_p8 = pnand %p704_p7, %p698_p4 }
  0x59   :  { %521 = vmatprep.subr.bf16.mxu0 %v733_v0  ;;  %541 = vmatprep.subr.bf16.mxu1 %v733_v0 }
  0x5c   :  { %522 = vmatpush3.bf16.msra.mxu0 %v588_v7  ;;  %542 = vmatpush3.bf16.msra.mxu1 %v597_v12 }
  0x5d   :  { %523 = vmatprep.subr.bf16.mxu0 %v733_v0  ;;  %543 = vmatprep.subr.bf16.mxu1 %v733_v0 }
  0x60   :  { %524 = vmatpush3.bf16.msra.mxu0 %v589_v9  ;;  %544 = vmatpush3.bf16.msra.mxu1 %v598_v14 }
  0x61   :  { %525 = vmatprep.subr.bf16.mxu0 %v733_v0  ;;  %545 = vmatprep.subr.bf16.mxu1 %v733_v0 }
  0x64   :  { %526 = vmatpush3.bf16.msra.mxu0 %v590_v11  ;;  %546 = vmatpush3.bf16.msra.mxu1 %v599_v16 }
  0x65   :  { %527 = vmatprep.subr.bf16.mxu0 %v733_v0  ;;  %547 = vmatprep.subr.bf16.mxu1 %v733_v0 }
  0x68   :  { %528 = vmatpush3.bf16.msra.mxu0 %v591_v13  ;;  %548 = vmatpush3.bf16.msra.mxu1 %v600_v17 }
  0x69   :  { %553 = vmatprep.subr.bf16.mxu0 %v733_v0 }
  0x6b   :  { %530 = vmatmul.mubr.bf16.vlgmr.msra.gmra.mrb[0].mxu0 %v592_v15 }
  0x6c   :  { %569 = vmatprep.mubr.msk.bf16.mxu0 %vm734_vm0, %v733_v0  ;;  %554 = vmatpush3.bf16.msra.mxu0 %v601_v18 }
  0x6d   :  { %555 = vmatprep.subr.bf16.mxu0 %v733_v0 }
  0x70   :  { %556 = vmatpush3.bf16.msra.mxu0 %v602_v19 }
  0x71   :  { %557 = vmatprep.subr.bf16.mxu0 %v733_v0 }
  0x74   :  { %558 = vmatpush3.bf16.msra.mxu0 %v603_v20 }
  0x75   :  { %559 = vmatprep.subr.bf16.mxu0 %v733_v0 }
  0x78   :  { %560 = vmatpush3.bf16.msra.mxu0 %v604_v21 }
  0x79   :  { %561 = vmatprep.subr.bf16.mxu0 %v733_v0 }
  0x7c   :  { %562 = vmatpush3.bf16.msra.mxu0 %v605_v22 }
  0x7d   :  { %563 = vmatprep.subr.bf16.mxu0 %v733_v0 }
  0x80   :  { %564 = vmatpush3.bf16.msra.mxu0 %v606_v23 }
  0x81   :  { %565 = vmatprep.subr.bf16.mxu0 %v733_v0 }
  0x84   :  { %566 = vmatpush3.bf16.msra.mxu0 %v607_v34 }
  0x85   :  { %567 = vmatprep.subr.bf16.mxu0 %v733_v0 }
  0x88   :  { %568 = vmatpush3.bf16.msra.mxu0 %v608_v35 }
 0x13e   :  { %v196_v25 = vpop.f32.mrb[0].mxu0 }
 0x13f   :  { %v197_v26 = vadd.f32 %v458_v24, %v196_v25  ;;  %v531_v27 = vpop.f32.mrb[1].mxu0 }
 0x140   :  { %v199_v28 = vpop.f32.mrb[2].mxu0 }
 0x141   :  { %v200_v29 = vadd.f32 %v458_v24, %v199_v28  ;;  %v532_v30 = vpop.f32.mrb[3].mxu0  ;;  %v203_v31 = vmax.f32 %v197_v26, 0.0 }
 0x143   :  { %v204_v32 = vmax.f32 %v200_v29, 0.0 }
 0x145   :  { %v205_v33 = vpack.c.bf16 %v204_v32, %v203_v31 }
 0x147   :  { %550 = vmatmul.mubr.bf16.vlgmr.msra.gmra.mrb[0].mxu1 %v205_v33 }
 0x21a   :  { %v313_v37 = vpop.f32.mrb[0].mxu1 }
 0x21b   :  { %v314_v38 = vadd.f32 %v468_v36, %v313_v37  ;;  %v551_v39 = vpop.f32.mrb[1].mxu1 }
 0x21c   :  { %v316_v40 = vpop.f32.mrb[2].mxu1 }
 0x21d   :  { %v317_v41 = vadd.f32 %v468_v36, %v316_v40  ;;  %v552_v42 = vpop.f32.mrb[3].mxu1  ;;  %v320_v43 = vmax.f32 %v314_v38, 0.0 }
 0x21f   :  { %v321_v44 = vmax.f32 %v317_v41, 0.0 }
 0x221   :  { %v322_v45 = vpack.c.bf16 %v321_v44, %v320_v43 }
 0x223   :  { %570 = vmatmul.mubr.bf16.vlgmr.msra.gmra.mrb[4].mxu0 %v322_v45 }
 0x2f6   :  { %v430_v47 = vpop.f32.mrb[4].mxu0 }
 0x2f7   :  { %v431_v48 = vadd.f32 %v477_v46, %v430_v47  ;;  %v571_v49 = vpop.f32.mrb[5].mxu0 }
 0x2f8   :  { %v433_v50 = vpop.f32.mrb[6].mxu0 }
 0x2f9   :  { %437 = vst [vmem:[#allocation11] sm:$0xff] %v431_v48  ;;  %v434_v51 = vadd.f32 %v477_v46, %v433_v50  ;;  %v572_v52 = vpop.f32.mrb[7].mxu0 }
 0x2fb   :  { %438 = vst [vmem:[#allocation11 + $0x8] sm:$0xff] %v434_v51 }
 0x2fc   :  { %708 = shalt.err (!%p705_p8)
}
 0x2fd   :  { %s709_s9 = scalar_lea.hbm %s910_s7, 256 }
 0x2fe   :  { %p710_p9 = scmp.ne.s32.totalorder %s910_s7, %s709_s9  ;;  %p713_p10 = scmp.lt.u32.totalorder %s709_s9, %s910_s7 }
 0x300   :  { %p715_p11 = pnand %p713_p10, %p710_p9 }
 0x302   :  { %718 = shalt.err (!%p715_p11)
}
 0x303   :  { %s736_s16 = smov 128   ;;  %s737_s0 = smov 8  }
 0x304   :  { %450 = dma.vmem_to_hbm [thread:$0]  %s445_s30, 256, %s910_s7, [#allocation5], %s736_s16, %s736_s16, %s737_s0  }
 0x305   :  { %725 = dma.done.wait [#allocation5], 256  }
 0x306   :  { %726 = vsyncadd [#allocation5], 4294967040 }
 0x307   :  { %454 = vsyncpa [#allocation4], 1 }
 0x308   :  { %455 = vsyncpa [#allocation7], 1 }
 0x309   :  { %456 = vsyncpa [#allocation10], 1 }
 0x30a   :  { %457 = vsyncpa [#allocation5], 1 }

</bundles_post_ra>
